<compile_context>
chip_gen: v7x
topology: tpu7x:2x2x1
jax: 0.10.0
libtpu: 0.0.40
codegen_flags: <defaults>
</compile_context>

<pallas_src>
import jax
import jax.numpy as jnp
from jax.experimental import pallas as pl
from jax.experimental.pallas import tpu as pltpu


# ---------------------------------------------------------------------------
# Pallas kernel: RoPE hot path (pure VPU FMA over a token tile)
# ---------------------------------------------------------------------------
def _make_rope_kernel(use_roll: bool):
    def kernel(q_ref, k_ref, cs_ref, qo_ref, ko_ref):
        # Packed per-token table block: [T, 2, D]; row 0 = cos, row 1 = signed
        # sin (rotate_half sign folded in at setup time).  Upcast to f32 for
        # the FMA regardless of storage dtype.
        cos = cs_ref[:, 0:1, :].astype(jnp.float32)   # [T, 1, D]
        sin = cs_ref[:, 1:2, :].astype(jnp.float32)   # [T, 1, D]

        def apply(x_ref, o_ref):
            x = x_ref[...].astype(jnp.float32)        # [T, H, D]
            d = x.shape[-1]
            h = d // 2
            if use_roll:
                # rotate_half(x) * sin == roll(x, D/2, lanes) * signed_sin
                rot = pltpu.roll(x, h, axis=x.ndim - 1)
            else:
                # Same half-swap, built with a lane concat; still a single
                # unmasked full-width store below.
                rot = jnp.concatenate([x[..., h:], x[..., :h]], axis=-1)
            o_ref[...] = (x * cos + rot * sin).astype(o_ref.dtype)

        apply(q_ref, qo_ref)
        apply(k_ref, ko_ref)

    return kernel


# ---------------------------------------------------------------------------
# Module-equivalent setup: cos/sin cache + packed (cos, signed-sin) table
# ---------------------------------------------------------------------------
def make_rope_tables(rotary_dim, max_position_embeddings, base=10000,
                     dtype=jnp.float32):
    """Returns (cos_cached_f32, sin_cached_f32, packed_table).

    packed_table has shape [max_pos, 2, rotary_dim] with [:,0]=cos and
    [:,1]=signed sin (first half negated), stored in `dtype` (the compute
    dtype of q/k, mirroring the torch module's `.to(query.dtype)` cast).
    """
    inv_freq = 1.0 / (base ** (jnp.arange(0, rotary_dim, 2, dtype=jnp.float32)
                               / rotary_dim))
    t = jnp.arange(max_position_embeddings, dtype=jnp.float32)
    freqs = jnp.einsum("i,j->ij", t, inv_freq)          # [max_pos, dim//2]
    emb = jnp.concatenate([freqs, freqs], axis=-1)      # [max_pos, dim]
    cos = jnp.cos(emb)
    sin = jnp.sin(emb)
    half = rotary_dim // 2
    sin_signed = jnp.concatenate([-sin[:, :half], sin[:, half:]], axis=-1)
    packed = jnp.stack([cos, sin_signed], axis=1).astype(dtype)  # [max_pos,2,D]
    return cos, sin, packed


# ---------------------------------------------------------------------------
# Tile sizing (VMEM-footprint aware, >= 2 grid steps for dual-TC chips)
# ---------------------------------------------------------------------------
def _round_up(x, m):
    return ((x + m - 1) // m) * m


def _sublane_tile(dtype):
    # 8 for 4-byte, 16 for 2-byte, 32 for 1-byte element types.
    return 8 * (4 // jnp.dtype(dtype).itemsize)


def _choose_tile_tokens(n_tokens, per_token_vmem_bytes,
                        vmem_budget_bytes=10 << 20, max_tile=1024):
    t = max(1, vmem_budget_bytes // max(per_token_vmem_bytes, 1))
    t = min(int(t), max_tile, n_tokens)
    if n_tokens > 1:
        # At least 2 grid steps so megacore / dual-TC (v7x) shards the grid.
        t = min(t, -(-n_tokens // 2))
    if t >= 8:
        t = (t // 8) * 8
    return max(t, 1)


# ---------------------------------------------------------------------------
# Forward wrapper (mirrors HpuRotaryEmbedding.forward)
# ---------------------------------------------------------------------------
def hpu_rotary_forward(positions, query, key, cos_sin_table, head_size):
    """RoPE forward. `cos_sin_table` is the packed [max_pos, 2, D] table from
    make_rope_tables.  For true in-place behaviour, jit the caller with
    donate_argnums on query and key."""
    # --- shape normalization, mirroring the torch module --------------------
    if query.ndim == 2:
        query = query[None]
    if key.ndim == 2:
        key = key[None]
    if positions.ndim == 1:
        positions = positions[None]

    B, S, q_hidden = query.shape
    D = head_size
    assert q_hidden % D == 0 and key.shape[-1] % D == 0
    # TODO(synk): partial rotary (rotary_dim < head_size) is not handled; the
    # module path exercised here has rotary_dim == head_size.
    assert cos_sin_table.shape[-1] == D and cos_sin_table.shape[-2] == 2
    assert D % 2 == 0
    Hq = q_hidden // D
    Hk = key.shape[-1] // D
    N = B * S

    # Token-major, lane-dense views (pure reshapes / bitcasts of the inputs).
    q3 = query.reshape(N, Hq, D)
    k3 = key.reshape(N, Hk, D)
    pos = positions.reshape(N)

    # Single gather of the packed table; already in the compute dtype.
    cs = cos_sin_table[pos]                               # [N, 2, D]

    # --- token tiling (account for sublane/lane padding in VMEM) -----------
    lanes = _round_up(D, 128)
    q_item = jnp.dtype(query.dtype).itemsize
    k_item = jnp.dtype(key.dtype).itemsize
    c_item = jnp.dtype(cs.dtype).itemsize
    per_token_vmem = (
        2 * _round_up(Hq, _sublane_tile(query.dtype)) * lanes * q_item     # q in+out
        + 2 * _round_up(Hk, _sublane_tile(key.dtype)) * lanes * k_item     # k in+out
        + _round_up(2, _sublane_tile(cs.dtype)) * lanes * c_item)          # cos/sin
    tile_n = _choose_tile_tokens(N, per_token_vmem)
    n_tiles = pl.cdiv(N, tile_n)          # ragged last block handled by Pallas

    q_spec = pl.BlockSpec((tile_n, Hq, D), lambda i: (i, 0, 0))
    k_spec = pl.BlockSpec((tile_n, Hk, D), lambda i: (i, 0, 0))
    cs_spec = pl.BlockSpec((tile_n, 2, D), lambda i: (i, 0, 0))

    # Explicit scoped-VMEM limit: double-buffered blocks + headroom.
    vmem_limit = int(min(max(2 * tile_n * per_token_vmem + (4 << 20),
                             16 << 20), 48 << 20))

    use_roll = (D % 128 == 0)             # full-lane XLU rotate when dense

    qo, ko = pl.pallas_call(
        _make_rope_kernel(use_roll),
        out_shape=(
            jax.ShapeDtypeStruct((N, Hq, D), query.dtype),
            jax.ShapeDtypeStruct((N, Hk, D), key.dtype),
        ),
        grid=(n_tiles,),
        in_specs=[q_spec, k_spec, cs_spec],
        out_specs=(q_spec, k_spec),
        input_output_aliases={0: 0, 1: 1},    # in-place RoPE (vLLM semantics)
        compiler_params=pltpu.CompilerParams(
            dimension_semantics=("parallel",),
            vmem_limit_bytes=vmem_limit),
    )(q3, k3, cs)

    return qo.reshape(B, S, Hq * D), ko.reshape(B, S, Hk * D)


# ---------------------------------------------------------------------------
# Pure-JAX reference (torch-module semantics) for verification
# ---------------------------------------------------------------------------
def _reference(positions, query, key, cos_cached, sin_cached, head_size):
    if query.ndim == 2:
        query = query[None]
    if key.ndim == 2:
        key = key[None]
    if positions.ndim == 1:
        positions = positions[None]
    B, S, _ = query.shape
    Hq = query.shape[-1] // head_size
    Hk = key.shape[-1] // head_size
    q4 = query.reshape(B, S, Hq, head_size).astype(jnp.float32)
    k4 = key.reshape(B, S, Hk, head_size).astype(jnp.float32)
    # Module: cos_cached[positions].unsqueeze(2).to(query.dtype)
    cos = cos_cached[positions][:, :, None, :].astype(query.dtype).astype(jnp.float32)
    sin = sin_cached[positions][:, :, None, :].astype(query.dtype).astype(jnp.float32)

    def rot_half(x):
        h = x.shape[-1] // 2
        return jnp.concatenate([-x[..., h:], x[..., :h]], axis=-1)

    qo = q4 * cos + rot_half(q4) * sin
    ko = k4 * cos + rot_half(k4) * sin
    return qo.reshape(B, S, -1), ko.reshape(B, S, -1)


if __name__ == "__main__":
    # query/key are donated so the kernel's in-place aliasing is not defeated
    # by defensive copies; callers must not reuse query/key afterwards.
    fwd = jax.jit(hpu_rotary_forward, static_argnames=("head_size",),
                  donate_argnums=(1, 2))

    def run_case(name, case_key, B, S, num_q_heads, num_kv_heads, head_size,
                 max_pos, dtype, tol):
        cos_c, sin_c, table = make_rope_tables(head_size, max_pos, 10000,
                                               dtype=dtype)
        kq, kk, kp = jax.random.split(case_key, 3)
        q = jax.random.normal(kq, (B, S, num_q_heads * head_size),
                              jnp.float32).astype(dtype)
        k = jax.random.normal(kk, (B, S, num_kv_heads * head_size),
                              jnp.float32).astype(dtype)
        pos = jax.random.randint(kp, (B, S), 0, max_pos, dtype=jnp.int32)

        q_ref, k_ref = _reference(pos, q, k, cos_c, sin_c, head_size)
        q_ref = jax.block_until_ready(q_ref)
        k_ref = jax.block_until_ready(k_ref)

        q_out, k_out = fwd(pos, q, k, table, head_size=head_size)
        q_out = jax.block_until_ready(q_out)
        k_out = jax.block_until_ready(k_out)

        assert q_out.shape == (B, S, num_q_heads * head_size), name
        assert k_out.shape == (B, S, num_kv_heads * head_size), name
        assert jnp.allclose(q_out.astype(jnp.float32), q_ref,
                            atol=tol, rtol=tol), name
        assert jnp.allclose(k_out.astype(jnp.float32), k_ref,
                            atol=tol, rtol=tol), name

    k1, k2 = jax.random.split(jax.random.PRNGKey(0))
    # Small module-style case: D=32 -> concat-rotate single-store path, f32,
    # N=16 splits into two token tiles (exercises the multi-tile grid).
    run_case("d32_f32", k1, B=2, S=8, num_q_heads=4, num_kv_heads=2,
             head_size=32, max_pos=64, dtype=jnp.float32, tol=1e-5)
    # Lane-dense case: D=128 -> pltpu.roll path, bf16 data + bf16 packed
    # cos/sin table, N=20 with tile 8 (exercises the ragged last block and
    # buffer donation).
    run_case("d128_bf16", k2, B=1, S=20, num_q_heads=4, num_kv_heads=2,
             head_size=128, max_pos=128, dtype=jnp.bfloat16, tol=2e-2)

    print("KERNEL_OK")
</pallas_src>

<mosaic_0001>
module attributes {stable_mosaic.version = 11 : i64} {
  func.func @kernel(%arg0: i32, %arg1: memref<8x4x32xf32, #tpu.memory_space<vmem>>, %arg2: memref<8x2x32xf32, #tpu.memory_space<vmem>>, %arg3: memref<8x2x32xf32, #tpu.memory_space<vmem>>, %arg4: memref<8x4x32xf32, #tpu.memory_space<vmem>>, %arg5: memref<8x2x32xf32, #tpu.memory_space<vmem>>) attributes {dimension_semantics = [#tpu.dimension_semantics<parallel>], iteration_bounds = array<i64: 2>, scalar_prefetch = 0 : i64, scratch_operands = 0 : i64, tpu.core_type = #tpu.core_type<tc>, window_params = [{transform_indices = @transform_0, window_bounds = array<i64: 8, 4, 32>}, {transform_indices = @transform_1, window_bounds = array<i64: 8, 2, 32>}, {transform_indices = @transform_2, window_bounds = array<i64: 8, 2, 32>}, {transform_indices = @transform_3, window_bounds = array<i64: 8, 4, 32>}, {transform_indices = @transform_4, window_bounds = array<i64: 8, 2, 32>}]} {
    %c0 = arith.constant 0 : index
    %c0_0 = arith.constant 0 : index
    %c0_1 = arith.constant 0 : index
    %0 = vector.load %arg3[%c0, %c0_0, %c0_1] : memref<8x2x32xf32, #tpu.memory_space<vmem>>, vector<8x1x32xf32>
    %c0_2 = arith.constant 0 : index
    %c1 = arith.constant 1 : index
    %c0_3 = arith.constant 0 : index
    %1 = vector.load %arg3[%c0_2, %c1, %c0_3] : memref<8x2x32xf32, #tpu.memory_space<vmem>>, vector<8x1x32xf32>
    %c0_4 = arith.constant 0 : index
    %c0_5 = arith.constant 0 : index
    %c0_6 = arith.constant 0 : index
    %2 = vector.load %arg1[%c0_4, %c0_5, %c0_6] : memref<8x4x32xf32, #tpu.memory_space<vmem>>, vector<8x4x32xf32>
    %3 = vector.extract_strided_slice %2 {offsets = [0, 0, 16], sizes = [8, 4, 16], strides = [1, 1, 1]} : vector<8x4x32xf32> to vector<8x4x16xf32>
    %4 = vector.extract_strided_slice %2 {offsets = [0, 0, 0], sizes = [8, 4, 16], strides = [1, 1, 1]} : vector<8x4x32xf32> to vector<8x4x16xf32>
    %5 = tpu.concatenate %3, %4 in 2 : vector<8x4x16xf32>, vector<8x4x16xf32> -> vector<8x4x32xf32>
    %6 = vector.broadcast %0 : vector<8x1x32xf32> to vector<8x4x32xf32>
    %7 = arith.mulf %2, %6 : vector<8x4x32xf32>
    %8 = vector.broadcast %1 : vector<8x1x32xf32> to vector<8x4x32xf32>
    %9 = arith.mulf %5, %8 : vector<8x4x32xf32>
    %10 = arith.addf %7, %9 : vector<8x4x32xf32>
    %c0_7 = arith.constant 0 : index
    %c0_8 = arith.constant 0 : index
    %c0_9 = arith.constant 0 : index
    %11 = vector.load %arg4[%c0_7, %c0_8, %c0_9] : memref<8x4x32xf32, #tpu.memory_space<vmem>>, vector<8x4x32xf32>
    tpu.vector_store %arg4[%c0_7, %c0_8, %c0_9], %10 {strides = array<i32>} : memref<8x4x32xf32, #tpu.memory_space<vmem>>, vector<8x4x32xf32>,
    %c0_10 = arith.constant 0 : index
    %c0_11 = arith.constant 0 : index
    %c0_12 = arith.constant 0 : index
    %12 = vector.load %arg2[%c0_10, %c0_11, %c0_12] : memref<8x2x32xf32, #tpu.memory_space<vmem>>, vector<8x2x32xf32>
    %13 = vector.extract_strided_slice %12 {offsets = [0, 0, 16], sizes = [8, 2, 16], strides = [1, 1, 1]} : vector<8x2x32xf32> to vector<8x2x16xf32>
    %14 = vector.extract_strided_slice %12 {offsets = [0, 0, 0], sizes = [8, 2, 16], strides = [1, 1, 1]} : vector<8x2x32xf32> to vector<8x2x16xf32>
    %15 = tpu.concatenate %13, %14 in 2 : vector<8x2x16xf32>, vector<8x2x16xf32> -> vector<8x2x32xf32>
    %16 = vector.broadcast %0 : vector<8x1x32xf32> to vector<8x2x32xf32>
    %17 = arith.mulf %12, %16 : vector<8x2x32xf32>
    %18 = vector.broadcast %1 : vector<8x1x32xf32> to vector<8x2x32xf32>
    %19 = arith.mulf %15, %18 : vector<8x2x32xf32>
    %20 = arith.addf %17, %19 : vector<8x2x32xf32>
    %c0_13 = arith.constant 0 : index
    %c0_14 = arith.constant 0 : index
    %c0_15 = arith.constant 0 : index
    %21 = vector.load %arg5[%c0_13, %c0_14, %c0_15] : memref<8x2x32xf32, #tpu.memory_space<vmem>>, vector<8x2x32xf32>
    tpu.vector_store %arg5[%c0_13, %c0_14, %c0_15], %20 {strides = array<i32>} : memref<8x2x32xf32, #tpu.memory_space<vmem>>, vector<8x2x32xf32>,
    return
  }
  func.func @transform_0(%arg0: i32) -> (i32, i32, i32) {
    %c0_i32 = arith.constant 0 : i32
    %c0_i32_0 = arith.constant 0 : i32
    %c0_i32_1 = arith.constant 0 : i32
    return %arg0, %c0_i32, %c0_i32_0 : i32, i32, i32
  }
  func.func @transform_1(%arg0: i32) -> (i32, i32, i32) {
    %c0_i32 = arith.constant 0 : i32
    %c0_i32_0 = arith.constant 0 : i32
    %c0_i32_1 = arith.constant 0 : i32
    return %arg0, %c0_i32, %c0_i32_0 : i32, i32, i32
  }
  func.func @transform_2(%arg0: i32) -> (i32, i32, i32) {
    %c0_i32 = arith.constant 0 : i32
    %c0_i32_0 = arith.constant 0 : i32
    %c0_i32_1 = arith.constant 0 : i32
    return %arg0, %c0_i32, %c0_i32_0 : i32, i32, i32
  }
  func.func @transform_3(%arg0: i32) -> (i32, i32, i32) {
    %c0_i32 = arith.constant 0 : i32
    %c0_i32_0 = arith.constant 0 : i32
    %c0_i32_1 = arith.constant 0 : i32
    return %arg0, %c0_i32, %c0_i32_0 : i32, i32, i32
  }
  func.func @transform_4(%arg0: i32) -> (i32, i32, i32) {
    %c0_i32 = arith.constant 0 : i32
    %c0_i32_0 = arith.constant 0 : i32
    %c0_i32_1 = arith.constant 0 : i32
    return %arg0, %c0_i32, %c0_i32_0 : i32, i32, i32
  }
}

</mosaic_0001>

<bundles_post_ra>
// kernel: hpu_rotary_forward.1
= control target key start
LH: loop header
LB: loop body
LE: loop exit
PB: predicated region body
PF: predicated region fallthrough
CT: control target
= control target key end

     0   :  { %s742_s15 = smov 0   ;;  %s1022_s0 = inlined_call_operand.vmem [shape: f32[16,4,32], index: 0, kind: input, shape index: {}, may-alias: {0,3}]   ;;  %s1023_s1 = inlined_call_operand.vmem [shape: f32[16,2,32], index: 1, kind: input, shape index: {}, may-alias: {1,4}]   ;;  %s1024_s2 = inlined_call_operand.vmem [shape: f32[16,2,32], index: 2, kind: input, shape index: {}]   ;;  %s1025_s3 = inlined_call_operand.vmem [shape: f32[16,4,32], index: 3, kind: output, shape index: {0}, may-alias: {0,3}]   ;;  %s1026_s4 = inlined_call_operand.vmem [shape: f32[16,2,32], index: 4, kind: output, shape index: {1}, may-alias: {1,4}]  }
   0x1 LB: > { %s664_s16 = sadd.s32 4294967295, %s713_s15   ;;  %p668_p0 = scmp.ge.s32.totalorder %s713_s15, 1  ;;  %s713_s15 = sphi %s742_s15, %s15_s15  }
   0x2   : > { %p188_p1 = scmp.lt.s32.totalorder %s713_s15, 3 }
   0x4   : > { %p189_p2 = pnand %p668_p0, %p188_p1 }
   0x5   : > { %s669_s17 = sshll.u32 (!%p189_p2), %s664_s16, 3  ;;  %s715_s22 = smov (!%p189_p2), 112   ;;  %vm339_vm0 = vcmask (!%p189_p2), 130048   ;;  %vm436_vm1 = vcmask (!%p189_p2), 257024   ;;  %vm541_vm2 = vcmask (!%p189_p2), 254976  }
   0x6   : > { %192 = sbr.rel (%p189_p2) target bundleno = 198 (0xc6), region = 32  ;;  %p230_p3 = scmp.lt.s32.totalorder (!%p189_p2), %s669_s17, 15 }
   0x7   : > { %s716_s23 = smov (!%p189_p2), 16  }
   0xd   : > { %s1028_s17 = smov (!%p230_p3, %s669_s17), 15 }
   0xe   : > { %s670_s18 = sshll.u32 %s1028_s17, 2  ;;  %s795_s24 = sshll.u32 %s1028_s17, 1 }
   0xf   : > { %s233_s21 = scalar_lea.vmem %s1022_s0, %s670_s18  ;;  %s239_s27 = scalar_lea.vmem %s1023_s1, %s795_s24 }
  0x10   : > { %v758_v0 = vld [vmem:[%s233_s21 + $0x8] sm:$0xf]  ;;  %v760_v1 = vld [vmem:[%s233_s21] sm:$0xf]  ;;  %v766_v2 = vld [vmem:[%s233_s21 + $0xc] sm:$0xf]  ;;  %s861_s30 = scalar_lea.vmem %s1024_s2, %s795_s24  ;;  %s893_s7 = scalar_lea.vmem %s1025_s3, %s670_s18 }
  0x11   : > { %295 = vrot.lane.b32.xlu1 %v758_v0, %s715_s22  ;;  %291 = vrot.lane.b32.xlu0 %v760_v1, %s715_s22  ;;  %v276_v3 = vld [vmem:[%s233_s21 + $0x4] sm:$0xf]  ;;  %v771_v4 = vld [vmem:[%s233_s21 + $0x14] sm:$0xf]  ;;  %s977_s10 = scalar_lea.vmem %s1026_s4, %s795_s24 }
  0x12   : > { %v773_v5 = vld [vmem:[%s233_s21 + $0x10] sm:$0xf]  ;;  %v779_v6 = vld [vmem:[%s233_s21 + $0x1c] sm:$0xf]  ;;  %v781_v7 = vld [vmem:[%s233_s21 + $0x18] sm:$0xf] }
  0x13   : > { %v809_v8 = vld [vmem:[%s239_s27 + $0x2] sm:$0x3]  ;;  %v811_v9 = vld [vmem:[%s239_s27] sm:$0x3]  ;;  %v817_v10 = vld [vmem:[%s239_s27 + $0x6] sm:$0x3] }
  0x14   : > { %v819_v11 = vld [vmem:[%s239_s27 + $0x4] sm:$0x3]  ;;  %v825_v12 = vld [vmem:[%s239_s27 + $0xa] sm:$0x3]  ;;  %v827_v13 = vld [vmem:[%s239_s27 + $0x8] sm:$0x3] }
  0x15   : > { %297 = vrot.lane.b32.xlu1 %v766_v2, %s715_s22  ;;  %293 = vrot.lane.b32.xlu0 %v276_v3, %s715_s22  ;;  %v833_v14 = vld [vmem:[%s239_s27 + $0xe] sm:$0x3]  ;;  %v835_v15 = vld [vmem:[%s239_s27 + $0xc] sm:$0x3] }
  0x16   : > { %v864_v24 = vld [vmem:[%s861_s30 + $0x2] ss:$0 sm:$0xff]  ;;  %v867_v25 = vld [vmem:[%s861_s30] ss:$0 sm:$0xff]  ;;  %v870_v26 = vld [vmem:[%s861_s30 + $0x3] ss:$0 sm:$0xff] }
  0x17   : > { %v873_v27 = vld [vmem:[%s861_s30 + $0x1] ss:$0 sm:$0xff]  ;;  %v381_v29 = vmul.f32 %v864_v24, %v276_v3  ;;  %v380_v31 = vmul.f32 %v867_v25, %v760_v1  ;;  %v881_v34 = vld [vmem:[%s861_s30 + $0x6] ss:$0 sm:$0xff]  ;;  %v884_v35 = vld [vmem:[%s861_s30 + $0x4] ss:$0 sm:$0xff] }
  0x18   : > { %v896_v38 = vld [vmem:[%s861_s30 + $0x7] ss:$0 sm:$0xff]  ;;  %v899_v39 = vld [vmem:[%s861_s30 + $0x5] ss:$0 sm:$0xff]  ;;  %v383_v42 = vmul.f32 %v881_v34, %v766_v2  ;;  %v382_v44 = vmul.f32 %v884_v35, %v758_v0  ;;  %v908_v48 = vld [vmem:[%s861_s30 + $0xa] ss:$0 sm:$0xff] }
  0x19   : > { %301 = vrot.lane.b32.xlu1 %v771_v4, %s715_s22  ;;  %299 = vrot.lane.b32.xlu0 %v773_v5, %s715_s22  ;;  %v911_v49 = vld [vmem:[%s861_s30 + $0x8] ss:$0 sm:$0xff]  ;;  %v920_v52 = vld [vmem:[%s861_s30 + $0xb] ss:$0 sm:$0xff]  ;;  %v385_v56 = vmul.f32 %v908_v48, %v771_v4 }
  0x1a   : > { %v923_v53 = vld [vmem:[%s861_s30 + $0x9] ss:$0 sm:$0xff]  ;;  %v384_v58 = vmul.f32 %v911_v49, %v773_v5  ;;  %v932_v62 = vld [vmem:[%s861_s30 + $0xe] ss:$0 sm:$0xff]  ;;  %v935_v63 = vld [vmem:[%s861_s30 + $0xc] ss:$0 sm:$0xff] }
  0x1d   : > { %305 = vrot.lane.b32.xlu1 %v779_v6, %s715_s22  ;;  %303 = vrot.lane.b32.xlu0 %v781_v7, %s715_s22 }
  0x21   : > { %317 = vrot.lane.b32.xlu1 %v276_v3, %s716_s23  ;;  %315 = vrot.lane.b32.xlu0 %v760_v1, %s716_s23  ;;  %v947_v3 = vld [vmem:[%s861_s30 + $0xd] ss:$0 sm:$0xff] }
  0x25   : > { %321 = vrot.lane.b32.xlu1 %v766_v2, %s716_s23  ;;  %319 = vrot.lane.b32.xlu0 %v758_v0, %s716_s23  ;;  %v944_v2 = vld [vmem:[%s861_s30 + $0xf] ss:$0 sm:$0xff] }
  0x29   : > { %325 = vrot.lane.b32.xlu1 %v771_v4, %s716_s23  ;;  %323 = vrot.lane.b32.xlu0 %v773_v5, %s716_s23 }
  0x2d   : > { %329 = vrot.lane.b32.xlu1 %v779_v6, %s716_s23  ;;  %327 = vrot.lane.b32.xlu0 %v781_v7, %s716_s23 }
  0x31   : > { %463 = vrot.lane.b32.xlu1 %v809_v8, %s715_s22  ;;  %461 = vrot.lane.b32.xlu0 %v811_v9, %s715_s22 }
  0x35   : > { %467 = vrot.lane.b32.xlu1 %v817_v10, %s715_s22  ;;  %465 = vrot.lane.b32.xlu0 %v819_v11, %s715_s22 }
  0x39   : > { %471 = vrot.lane.b32.xlu1 %v825_v12, %s715_s22  ;;  %469 = vrot.lane.b32.xlu0 %v827_v13, %s715_s22 }
  0x3d   : > { %475 = vrot.lane.b32.xlu1 %v833_v14, %s715_s22  ;;  %473 = vrot.lane.b32.xlu0 %v835_v15, %s715_s22 }
  0x41   : > { %487 = vrot.lane.b32.xlu1 %v809_v8, %s716_s23  ;;  %485 = vrot.lane.b32.xlu0 %v811_v9, %s716_s23 }
  0x45   : > { %491 = vrot.lane.b32.xlu1 %v817_v10, %s716_s23  ;;  %489 = vrot.lane.b32.xlu0 %v819_v11, %s716_s23 }
  0x49   : > { %495 = vrot.lane.b32.xlu1 %v825_v12, %s716_s23  ;;  %493 = vrot.lane.b32.xlu0 %v827_v13, %s716_s23 }
  0x4d   : > { %499 = vrot.lane.b32.xlu1 %v833_v14, %s716_s23  ;;  %497 = vrot.lane.b32.xlu0 %v835_v15, %s716_s23 }
  0x83   : > { %v296_v16 = vpop.permute.xlu1 %295  ;;  %v292_v17 = vpop.permute.xlu0 %291 }
  0x87   : > { %v298_v18 = vpop.permute.xlu1 %297  ;;  %v294_v19 = vpop.permute.xlu0 %293 }
  0x8b   : > { %v302_v20 = vpop.permute.xlu1 %301  ;;  %v300_v21 = vpop.permute.xlu0 %299 }
  0x8f   : > { %v306_v22 = vpop.permute.xlu1 %305  ;;  %v304_v23 = vpop.permute.xlu0 %303 }
  0x93   : > { %v318_v28 = vpop.permute.xlu1 %317  ;;  %v316_v30 = vpop.permute.xlu0 %315 }
  0x94   : > { %v341_v32 = vsel %vm339_vm0, %v294_v19, %v318_v28  ;;  %v340_v33 = vsel %vm339_vm0, %v292_v17, %v316_v30 }
  0x95   : > { %v421_v36 = vmul.f32 %v870_v26, %v341_v32  ;;  %v420_v37 = vmul.f32 %v873_v27, %v340_v33 }
  0x97   : > { %v429_v40 = vadd.f32 %v421_v36, %v381_v29  ;;  %v428_v41 = vadd.f32 %v420_v37, %v380_v31  ;;  %v322_v43 = vpop.permute.xlu1 %321  ;;  %v320_v45 = vpop.permute.xlu0 %319 }
  0x98   : > { %v343_v46 = vsel %vm339_vm0, %v298_v18, %v322_v43  ;;  %v342_v47 = vsel %vm339_vm0, %v296_v16, %v320_v45  ;;  %v387_v16 = vmul.f32 %v932_v62, %v779_v6  ;;  %v386_v18 = vmul.f32 %v935_v63, %v781_v7 }
  0x99   : > { %438 = vst.msk [vmem:[%s893_s7 + $0x4] sm:$0xf] %vm436_vm1, %v429_v40  ;;  %437 = vst.msk [vmem:[%s893_s7] sm:$0xf] %vm436_vm1, %v428_v41  ;;  %v423_v50 = vmul.f32 %v896_v38, %v343_v46  ;;  %v422_v51 = vmul.f32 %v899_v39, %v342_v47  ;;  %v518_v40 = vmul.f32 %v864_v24, %v809_v8 }
  0x9b   : > { %v431_v54 = vadd.f32 %v423_v50, %v383_v42  ;;  %v430_v55 = vadd.f32 %v422_v51, %v382_v44  ;;  %v326_v57 = vpop.permute.xlu1 %325  ;;  %v324_v59 = vpop.permute.xlu0 %323  ;;  %v517_v42 = vmul.f32 %v867_v25, %v811_v9  ;;  %v520_v9 = vmul.f32 %v881_v34, %v817_v10 }
  0x9c   : > { %v345_v60 = vsel %vm339_vm0, %v302_v20, %v326_v57  ;;  %v344_v61 = vsel %vm339_vm0, %v300_v21, %v324_v59  ;;  %v519_v50 = vmul.f32 %v884_v35, %v819_v11  ;;  %v522_v11 = vmul.f32 %v908_v48, %v825_v12 }
  0x9d   : > { %440 = vst.msk [vmem:[%s893_s7 + $0xc] sm:$0xf] %vm436_vm1, %v431_v54  ;;  %439 = vst.msk [vmem:[%s893_s7 + $0x8] sm:$0xf] %vm436_vm1, %v430_v55  ;;  %v425_v0 = vmul.f32 %v920_v52, %v345_v60  ;;  %v424_v1 = vmul.f32 %v923_v53, %v344_v61  ;;  %v523_v60 = vmul.f32 %v935_v63, %v835_v15 }
  0x9f   : > { %v433_v4 = vadd.f32 %v425_v0, %v385_v56  ;;  %v432_v5 = vadd.f32 %v424_v1, %v384_v58  ;;  %v330_v17 = vpop.permute.xlu1 %329  ;;  %v328_v19 = vpop.permute.xlu0 %327  ;;  %v521_v56 = vmul.f32 %v911_v49, %v827_v13  ;;  %v524_v13 = vmul.f32 %v932_v62, %v833_v14 }
  0xa0   : > { %v347_v20 = vsel %vm339_vm0, %v306_v22, %v330_v17  ;;  %v346_v21 = vsel %vm339_vm0, %v304_v23, %v328_v19 }
  0xa1   : > { %442 = vst.msk [vmem:[%s893_s7 + $0x14] sm:$0xf] %vm436_vm1, %v433_v4  ;;  %441 = vst.msk [vmem:[%s893_s7 + $0x10] sm:$0xf] %vm436_vm1, %v432_v5  ;;  %v427_v28 = vmul.f32 %v944_v2, %v347_v20  ;;  %v426_v29 = vmul.f32 %v947_v3, %v346_v21 }
  0xa3   : > { %v435_v30 = vadd.f32 %v427_v28, %v387_v16  ;;  %v434_v31 = vadd.f32 %v426_v29, %v386_v18  ;;  %v464_v6 = vpop.permute.xlu1 %463  ;;  %v462_v32 = vpop.permute.xlu0 %461 }
  0xa5   : > { %444 = vst.msk [vmem:[%s893_s7 + $0x1c] sm:$0xf] %vm436_vm1, %v435_v30  ;;  %443 = vst.msk [vmem:[%s893_s7 + $0x18] sm:$0xf] %vm436_vm1, %v434_v31 }
  0xa7   : > { %v468_v7 = vpop.permute.xlu1 %467  ;;  %v466_v22 = vpop.permute.xlu0 %465 }
  0xab   : > { %v472_v23 = vpop.permute.xlu1 %471  ;;  %v470_v33 = vpop.permute.xlu0 %469 }
  0xaf   : > { %v476_v36 = vpop.permute.xlu1 %475  ;;  %v474_v37 = vpop.permute.xlu0 %473 }
  0xb3   : > { %v488_v41 = vpop.permute.xlu1 %487  ;;  %v486_v43 = vpop.permute.xlu0 %485 }
  0xb4   : > { %v510_v44 = vsel %vm339_vm0, %v464_v6, %v488_v41  ;;  %v509_v45 = vsel %vm339_vm0, %v462_v32, %v486_v43 }
  0xb5   : > { %v526_v46 = vmul.f32 %v870_v26, %v510_v44  ;;  %v525_v47 = vmul.f32 %v873_v27, %v509_v45 }
  0xb7   : > { %v534_v8 = vadd.f32 %v526_v46, %v518_v40  ;;  %v533_v24 = vadd.f32 %v525_v47, %v517_v42  ;;  %v492_v25 = vpop.permute.xlu1 %491  ;;  %v490_v26 = vpop.permute.xlu0 %489 }
  0xb8   : > { %v512_v27 = vsel %vm339_vm0, %v468_v7, %v492_v25  ;;  %v511_v51 = vsel %vm339_vm0, %v466_v22, %v490_v26 }
  0xb9   : > { %543 = vst.msk [vmem:[%s977_s10 + $0x2] sm:$0x3] %vm541_vm2, %v534_v8  ;;  %542 = vst.msk [vmem:[%s977_s10] sm:$0x3] %vm541_vm2, %v533_v24  ;;  %v528_v54 = vmul.f32 %v896_v38, %v512_v27  ;;  %v527_v55 = vmul.f32 %v899_v39, %v511_v51 }
  0xbb   : > { %v536_v10 = vadd.f32 %v528_v54, %v520_v9  ;;  %v535_v34 = vadd.f32 %v527_v55, %v519_v50  ;;  %v496_v35 = vpop.permute.xlu1 %495  ;;  %v494_v57 = vpop.permute.xlu0 %493 }
  0xbc   : > { %v514_v58 = vsel %vm339_vm0, %v472_v23, %v496_v35  ;;  %v513_v59 = vsel %vm339_vm0, %v470_v33, %v494_v57 }
  0xbd   : > { %545 = vst.msk [vmem:[%s977_s10 + $0x6] sm:$0x3] %vm541_vm2, %v536_v10  ;;  %544 = vst.msk [vmem:[%s977_s10 + $0x4] sm:$0x3] %vm541_vm2, %v535_v34  ;;  %v530_v38 = vmul.f32 %v920_v52, %v514_v58  ;;  %v529_v12 = vmul.f32 %v923_v53, %v513_v59 }
  0xbf   : > { %v538_v39 = vadd.f32 %v530_v38, %v522_v11  ;;  %v537_v48 = vadd.f32 %v529_v12, %v521_v56  ;;  %v500_v49 = vpop.permute.xlu1 %499  ;;  %v498_v61 = vpop.permute.xlu0 %497 }
  0xc0   : > { %v516_v0 = vsel %vm339_vm0, %v476_v36, %v500_v49  ;;  %v515_v1 = vsel %vm339_vm0, %v474_v37, %v498_v61 }
  0xc1   : > { %547 = vst.msk [vmem:[%s977_s10 + $0xa] sm:$0x3] %vm541_vm2, %v538_v39  ;;  %546 = vst.msk [vmem:[%s977_s10 + $0x8] sm:$0x3] %vm541_vm2, %v537_v48  ;;  %v532_v52 = vmul.f32 %v944_v2, %v516_v0  ;;  %v531_v53 = vmul.f32 %v947_v3, %v515_v1 }
  0xc3   : > { %v540_v4 = vadd.f32 %v532_v52, %v524_v13  ;;  %v539_v5 = vadd.f32 %v531_v53, %v523_v60 }
  0xc5   : > { %549 = vst.msk [vmem:[%s977_s10 + $0xe] sm:$0x3] %vm541_vm2, %v540_v4  ;;  %548 = vst.msk [vmem:[%s977_s10 + $0xc] sm:$0x3] %vm541_vm2, %v539_v5 }
  0xc6 PF: > { %s15_s15 = sadd.s32 1, %s713_s15  }
  0xc7   : > { %p12_p4 = scmp.ge.s32.totalorder %s15_s15, 4  }
  0xc9   :  { %14 = sbr.rel (!%p12_p4) target bundleno = 1 (0x1), region = 80 }

</bundles_post_ra>
